<compile_context>
chip_gen: v6e
topology: v6e:2x2x1
jax: 0.10.0
libtpu: 0.0.40
codegen_flags: <defaults>
</compile_context>

<pallas_src>
import functools

import jax
import jax.numpy as jnp
from jax import lax
from jax.experimental import pallas as pl
from jax.experimental.pallas import tpu as pltpu


def _round_up(x, m):
    return (x + m - 1) // m * m


def _gelu_exact(x):
    # PyTorch nn.GELU() default: 0.5 * x * (1 + erf(x / sqrt(2)))
    return 0.5 * x * (1.0 + lax.erf(x * 0.7071067811865476))


# ---------------------------------------------------------------------------
# Hardware / capability queries (cached, never raise)
# ---------------------------------------------------------------------------
@functools.lru_cache(maxsize=None)
def _vmem_capacity_bytes():
    try:
        cap = int(pltpu.get_tpu_info().vmem_capacity_bytes)
        if 16 * 1024 * 1024 <= cap <= 512 * 1024 * 1024:
            return cap
    except Exception:
        pass
    return 64 * 1024 * 1024  # conservative: v7x per-TensorCore VMEM


def _probe_kernel(w_ref, x_ref, o_ref):
    o_ref[...] = x_ref[...] + w_ref[...]


@functools.lru_cache(maxsize=None)
def _single_buffer_supported():
    """True iff this Pallas build accepts pipeline_mode=pl.Buffered(1)."""
    try:
        fn = pl.pallas_call(
            _probe_kernel,
            out_shape=jax.ShapeDtypeStruct((16, 128), jnp.float32),
            grid=(2, 2),
            in_specs=[
                pl.BlockSpec((8, 128), lambda i, j: (0, 0),
                             pipeline_mode=pl.Buffered(1)),   # resident-style
                pl.BlockSpec((8, 128), lambda i, j: (i, 0)),  # streamed-style
            ],
            out_specs=pl.BlockSpec((8, 128), lambda i, j: (i, 0)),
            compiler_params=pltpu.CompilerParams(
                dimension_semantics=("parallel", "arbitrary")),
        )
        out = fn(jnp.ones((8, 128), jnp.float32),
                 jnp.ones((16, 128), jnp.float32))
        out = jax.block_until_ready(out)
        return bool(jnp.all(out == 2.0))
    except Exception:
        return False


def _resident_spec(block_shape, index_map):
    """BlockSpec for a block whose index_map is constant: single-buffer it
    when supported (it is only ever fetched once)."""
    if _single_buffer_supported():
        return pl.BlockSpec(block_shape, index_map,
                            pipeline_mode=pl.Buffered(1))
    return pl.BlockSpec(block_shape, index_map)


# ---------------------------------------------------------------------------
# Kernels
# ---------------------------------------------------------------------------
def _mlp_kernel_resident_w3(x_ref, w1_ref, b1_ref, w2_ref, b2_ref,
                            w3_ref, b3_ref, o_ref):
    # Fast path: every weight is VMEM-resident; 1-D grid over token tiles.
    h = jnp.dot(x_ref[...], w1_ref[...], preferred_element_type=jnp.float32)
    h = _gelu_exact(h + b1_ref[...])
    h = jnp.dot(h.astype(w2_ref.dtype), w2_ref[...],
                preferred_element_type=jnp.float32)
    h = _gelu_exact(h + b2_ref[...])
    out = jnp.dot(h.astype(w3_ref.dtype), w3_ref[...],
                  preferred_element_type=jnp.float32)
    o_ref[...] = (out + b3_ref[...]).astype(o_ref.dtype)


def _mlp_kernel_vocab_tiled(x_ref, w1_ref, b1_ref, w2_ref, b2_ref,
                            w3_ref, b3_ref, o_ref, h_scratch):
    # Hidden path runs once per token tile (vocab-tile index j == 0); result is
    # reused from VMEM scratch for the remaining vocab tiles.  This requires
    # the vocab axis to stay the innermost, "arbitrary" grid axis.
    @pl.when(pl.program_id(1) == 0)
    def _():
        h = jnp.dot(x_ref[...], w1_ref[...],
                    preferred_element_type=jnp.float32)
        h = _gelu_exact(h + b1_ref[...])
        h = jnp.dot(h.astype(w2_ref.dtype), w2_ref[...],
                    preferred_element_type=jnp.float32)
        h = _gelu_exact(h + b2_ref[...])
        h_scratch[...] = h.astype(h_scratch.dtype)

    out = jnp.dot(h_scratch[...], w3_ref[...],
                  preferred_element_type=jnp.float32)            # (tm, tn)
    o_ref[...] = (out + b3_ref[...]).astype(o_ref.dtype)


# ---------------------------------------------------------------------------
# Tile / path selection under a VMEM byte budget
# ---------------------------------------------------------------------------
def _select_config(M, F_pad, V_pad, compute_bytes, budget, forced_tn=None):
    """Return (tm, tn, w3_resident)."""
    acc = 4  # f32 accumulators / outputs / biases
    w_buf = 1 if _single_buffer_supported() else 2
    resident_w12 = w_buf * (compute_bytes * 2 * F_pad * F_pad + acc * 2 * F_pad)
    if resident_w12 > budget:
        # TODO(synk): tile the hidden matmuls over K once 2*F_pad^2 weights no
        # longer fit VMEM (F >~ 2k on v7x).
        raise ValueError(
            f"feature_dim too large for resident hidden weights "
            f"({resident_w12} B > {budget} B VMEM budget)")

    if M <= 128:
        # Decode-style: pad the token axis to the sublane (8) only.
        tm_cands = [max(8, _round_up(M, 8))]
    else:
        cap_tm = _round_up(M, 128)
        if M >= 512:
            # Keep >= 2 token tiles so both v7x TensorCores get work on the
            # "parallel" token axis.
            cap_tm = min(cap_tm, _round_up(-(-M // 2), 256))
        tm_cands = [t for t in (1024, 512, 256, 128) if t <= cap_tm] or [128]

    def hidden_work(tm):
        # x tile (double-buffered) + allowance for the f32 h1/h2 intermediates.
        return 2 * compute_bytes * tm * F_pad + 3 * acc * tm * F_pad

    # Fast path: whole w3/b3 resident -> w3 streamed from HBM exactly once.
    if forced_tn is None:
        resident_w3 = w_buf * (compute_bytes * F_pad * V_pad + acc * V_pad)
        for tm in tm_cands:
            need = (resident_w12 + resident_w3 + hidden_work(tm)
                    + 2 * acc * tm * V_pad)          # out tile, double-buffered
            if need <= budget:
                return tm, V_pad, True

    # Tiled path: stream w3 vocab tiles; prefer large tm (halves the dominant
    # (M_pad/tm)*F_pad*V_pad w3 HBM traffic), then large tn (MXU fill, fewer
    # grid steps).
    tn_cands = (forced_tn,) if forced_tn is not None else (512, 256, 128)
    for tm in tm_cands:
        for tn in tn_cands:
            if V_pad % tn:
                continue
            need = (resident_w12
                    + 2 * (compute_bytes * F_pad * tn + acc * tn)  # w3/b3 tiles
                    + hidden_work(tm)
                    + compute_bytes * tm * F_pad                   # h_scratch
                    + 2 * acc * tm * tn)                           # out tile
            if need <= budget:
                return tm, tn, False
    return tm_cands[-1], 128, False


# ---------------------------------------------------------------------------
# Public forward
# ---------------------------------------------------------------------------
def text_generator_forward(x, params, *, compute_dtype=jnp.float32,
                           vocab_tile=None):
    """x: (B, S, F) float32. params: dict of w1,b1,w2,b2,w3,b3 in (in, out) layout.

    compute_dtype: dtype fed to the MXU (f32 default = bit-compatible with the
      PyTorch reference; bf16 for v6e/v7x MXU peak, accumulation stays f32).
    vocab_tile: force the vocab-tiled path with this tile size (multiple of
      128); None lets the VMEM budget decide.
    The whole function is jit-compatible; for repeated inference, hoist the
    padding / w3 layout transform out of the hot path.
    """
    B, S, F = x.shape
    V = params["w3"].shape[1]
    M = B * S
    compute_dtype = jnp.dtype(compute_dtype)
    compute_bytes = compute_dtype.itemsize

    if vocab_tile is not None and vocab_tile % 128:
        raise ValueError("vocab_tile must be a multiple of 128")

    # ---- pad to TPU-friendly shapes (lane axis multiples of 128) ------------
    F_pad = _round_up(F, 128)
    v_align = vocab_tile if vocab_tile is not None else 128
    V_pad = _round_up(V, v_align)

    cap = _vmem_capacity_bytes()
    budget = cap - max(8 * 1024 * 1024, cap // 8)
    tm, tn, w3_resident = _select_config(M, F_pad, V_pad, compute_bytes,
                                         budget, forced_tn=vocab_tile)
    M_pad = _round_up(M, tm)

    x2d = jnp.pad(x.reshape(M, F),
                  ((0, M_pad - M), (0, F_pad - F))).astype(compute_dtype)
    w1 = jnp.pad(params["w1"], ((0, F_pad - F), (0, F_pad - F))).astype(compute_dtype)
    w2 = jnp.pad(params["w2"], ((0, F_pad - F), (0, F_pad - F))).astype(compute_dtype)
    w3 = jnp.pad(params["w3"], ((0, F_pad - F), (0, V_pad - V))).astype(compute_dtype)
    b1 = jnp.pad(params["b1"], ((0, 0), (0, F_pad - F))).astype(jnp.float32)
    b2 = jnp.pad(params["b2"], ((0, 0), (0, F_pad - F))).astype(jnp.float32)
    b3 = jnp.pad(params["b3"], ((0, 0), (0, V_pad - V))).astype(jnp.float32)
    # Zero-padded weight columns + zero bias keep padded hidden features at
    # gelu(0) == 0, so padding never leaks into the un-padded output slice.

    # ---- VMEM limit derived from the measured capacity -----------------------
    acc = 4
    w_buf = 1 if _single_buffer_supported() else 2
    est = w_buf * (compute_bytes * 2 * F_pad * F_pad + acc * 2 * F_pad)
    est += 2 * compute_bytes * tm * F_pad + 3 * acc * tm * F_pad
    if w3_resident:
        est += w_buf * (compute_bytes * F_pad * V_pad + acc * V_pad)
        est += 2 * acc * tm * V_pad
    else:
        est += 2 * (compute_bytes * F_pad * tn + acc * tn)
        est += compute_bytes * tm * F_pad + 2 * acc * tm * tn
    vmem_limit = max(est + 8 * 1024 * 1024, 32 * 1024 * 1024)
    vmem_limit = min(vmem_limit, cap - 8 * 1024 * 1024, 100 * 1024 * 1024)

    if w3_resident:
        out2d = pl.pallas_call(
            _mlp_kernel_resident_w3,
            out_shape=jax.ShapeDtypeStruct((M_pad, V_pad), jnp.float32),
            grid=(M_pad // tm,),
            in_specs=[
                pl.BlockSpec((tm, F_pad), lambda i: (i, 0)),        # x
                _resident_spec((F_pad, F_pad), lambda i: (0, 0)),   # w1
                _resident_spec((1, F_pad), lambda i: (0, 0)),       # b1
                _resident_spec((F_pad, F_pad), lambda i: (0, 0)),   # w2
                _resident_spec((1, F_pad), lambda i: (0, 0)),       # b2
                _resident_spec((F_pad, V_pad), lambda i: (0, 0)),   # w3
                _resident_spec((1, V_pad), lambda i: (0, 0)),       # b3
            ],
            out_specs=pl.BlockSpec((tm, V_pad), lambda i: (i, 0)),
            compiler_params=pltpu.CompilerParams(
                dimension_semantics=("parallel",),
                vmem_limit_bytes=vmem_limit,
            ),
        )(x2d, w1, b1, w2, b2, w3, b3)
    else:
        # Tile-contiguous w3 layout: each per-j DMA is one contiguous slab of
        # F_pad*tn elements instead of F_pad strided rows.
        v_tiles = V_pad // tn
        w3_tiled = w3.reshape(F_pad, v_tiles, tn).transpose(1, 0, 2)
        out2d = pl.pallas_call(
            _mlp_kernel_vocab_tiled,
            out_shape=jax.ShapeDtypeStruct((M_pad, V_pad), jnp.float32),
            grid=(M_pad // tm, v_tiles),
            in_specs=[
                pl.BlockSpec((tm, F_pad), lambda i, j: (i, 0)),         # x
                _resident_spec((F_pad, F_pad), lambda i, j: (0, 0)),    # w1
                _resident_spec((1, F_pad), lambda i, j: (0, 0)),        # b1
                _resident_spec((F_pad, F_pad), lambda i, j: (0, 0)),    # w2
                _resident_spec((1, F_pad), lambda i, j: (0, 0)),        # b2
                pl.BlockSpec((None, F_pad, tn), lambda i, j: (j, 0, 0)),  # w3 slab
                pl.BlockSpec((1, tn), lambda i, j: (0, j)),             # b3
            ],
            out_specs=pl.BlockSpec((tm, tn), lambda i, j: (i, j)),
            scratch_shapes=[pltpu.VMEM((tm, F_pad), compute_dtype)],
            compiler_params=pltpu.CompilerParams(
                # vocab must stay innermost/"arbitrary": j == 0 fills h_scratch
                # that the remaining vocab tiles of the same token tile reuse.
                dimension_semantics=("parallel", "arbitrary"),
                vmem_limit_bytes=vmem_limit,
            ),
        )(x2d, w1, b1, w2, b2, w3_tiled, b3)

    return out2d[:M, :V].reshape(B, S, V)


# ---------------------------------------------------------------------------
# Params + pure-JAX reference
# ---------------------------------------------------------------------------
def init_params(key, feature_dim, vocab_dim):
    k1, k2, k3, k4, k5, k6 = jax.random.split(key, 6)
    scale = 1.0 / jnp.sqrt(feature_dim)
    return {
        # stored as (in, out); biases kept 2-D (1, out) for TPU-friendly layout
        "w1": jax.random.uniform(k1, (feature_dim, feature_dim), jnp.float32, -scale, scale),
        "b1": jax.random.uniform(k2, (1, feature_dim), jnp.float32, -scale, scale),
        "w2": jax.random.uniform(k3, (feature_dim, feature_dim), jnp.float32, -scale, scale),
        "b2": jax.random.uniform(k4, (1, feature_dim), jnp.float32, -scale, scale),
        "w3": jax.random.uniform(k5, (feature_dim, vocab_dim), jnp.float32, -scale, scale),
        "b3": jax.random.uniform(k6, (1, vocab_dim), jnp.float32, -scale, scale),
    }


def _reference_forward(x, params):
    def gelu(v):
        return 0.5 * v * (1.0 + lax.erf(v / jnp.sqrt(2.0)))
    h = gelu(x @ params["w1"] + params["b1"][0])
    h = gelu(h @ params["w2"] + params["b2"][0])
    return h @ params["w3"] + params["b3"][0]


if __name__ == "__main__":
    key = jax.random.PRNGKey(0)
    k_x1, k_p1, k_x2, k_p2 = jax.random.split(key, 4)

    # Config 1: small, module-consistent shapes -> whole-w3-resident fast path.
    batch, seq, feature_dim, vocab_dim = 2, 8, 32, 64
    x1 = jax.random.normal(k_x1, (batch, seq, feature_dim), jnp.float32)
    params1 = init_params(k_p1, feature_dim, vocab_dim)
    out1 = jax.block_until_ready(text_generator_forward(x1, params1))
    ref1 = _reference_forward(x1, params1)
    assert out1.shape == (batch, seq, vocab_dim), out1.shape
    assert jnp.allclose(out1, ref1, atol=1e-5, rtol=1e-5), "fast path mismatch"

    # Config 2: force the vocab-tiled path (streamed, tile-contiguous w3),
    # padding on every axis and >= 2 token tiles.
    b2_, s2_, f2_, v2_ = 3, 128, 48, 200
    x2 = jax.random.normal(k_x2, (b2_, s2_, f2_), jnp.float32)
    params2 = init_params(k_p2, f2_, v2_)
    out2 = jax.block_until_ready(
        text_generator_forward(x2, params2, vocab_tile=128))
    ref2 = _reference_forward(x2, params2)
    assert out2.shape == (b2_, s2_, v2_), out2.shape
    assert jnp.allclose(out2, ref2, atol=1e-4, rtol=1e-4), "tiled path mismatch"

    print("KERNEL_OK")
</pallas_src>

<mosaic_0001>
module attributes {stable_mosaic.version = 11 : i64} {
  func.func @_probe_kernel(%arg0: i32, %arg1: i32, %arg2: memref<8x128xf32, #tpu.memory_space<vmem>>, %arg3: memref<8x128xf32, #tpu.memory_space<vmem>>, %arg4: memref<8x128xf32, #tpu.memory_space<vmem>>) attributes {dimension_semantics = [#tpu.dimension_semantics<parallel>, #tpu.dimension_semantics<arbitrary>], iteration_bounds = array<i64: 2, 2>, scalar_prefetch = 0 : i64, scratch_operands = 0 : i64, tpu.core_type = #tpu.core_type<tc>, window_params = [{pipeline_mode = #tpu.pipeline_mode<synchronous>, transform_indices = @transform_0, window_bounds = array<i64: 8, 128>}, {transform_indices = @transform_1, window_bounds = array<i64: 8, 128>}, {transform_indices = @transform_2, window_bounds = array<i64: 8, 128>}]} {
    %c0 = arith.constant 0 : index
    %c0_0 = arith.constant 0 : index
    %0 = vector.load %arg3[%c0, %c0_0] : memref<8x128xf32, #tpu.memory_space<vmem>>, vector<8x128xf32>
    %c0_1 = arith.constant 0 : index
    %c0_2 = arith.constant 0 : index
    %1 = vector.load %arg2[%c0_1, %c0_2] : memref<8x128xf32, #tpu.memory_space<vmem>>, vector<8x128xf32>
    %2 = arith.addf %0, %1 : vector<8x128xf32>
    %c0_3 = arith.constant 0 : index
    %c0_4 = arith.constant 0 : index
    %3 = vector.load %arg4[%c0_3, %c0_4] : memref<8x128xf32, #tpu.memory_space<vmem>>, vector<8x128xf32>
    tpu.vector_store %arg4[%c0_3, %c0_4], %2 {strides = array<i32>} : memref<8x128xf32, #tpu.memory_space<vmem>>, vector<8x128xf32>,
    return
  }
  func.func @transform_0(%arg0: i32, %arg1: i32) -> (i32, i32) {
    %c0_i32 = arith.constant 0 : i32
    %c0_i32_0 = arith.constant 0 : i32
    %c0_i32_1 = arith.constant 0 : i32
    return %c0_i32, %c0_i32_0 : i32, i32
  }
  func.func @transform_1(%arg0: i32, %arg1: i32) -> (i32, i32) {
    %c0_i32 = arith.constant 0 : i32
    %c0_i32_0 = arith.constant 0 : i32
    return %arg0, %c0_i32 : i32, i32
  }
  func.func @transform_2(%arg0: i32, %arg1: i32) -> (i32, i32) {
    %c0_i32 = arith.constant 0 : i32
    %c0_i32_0 = arith.constant 0 : i32
    return %arg0, %c0_i32 : i32, i32
  }
}

module attributes {stable_mosaic.version = 11 : i64} {
  func.func @_mlp_kernel_resident_w3(%arg0: i32, %arg1: memref<16x128xf32, #tpu.memory_space<vmem>>, %arg2: memref<128x128xf32, #tpu.memory_space<vmem>>, %arg3: memref<1x128xf32, #tpu.memory_space<vmem>>, %arg4: memref<128x128xf32, #tpu.memory_space<vmem>>, %arg5: memref<1x128xf32, #tpu.memory_space<vmem>>, %arg6: memref<128x128xf32, #tpu.memory_space<vmem>>, %arg7: memref<1x128xf32, #tpu.memory_space<vmem>>, %arg8: memref<16x128xf32, #tpu.memory_space<vmem>>) attributes {dimension_semantics = [#tpu.dimension_semantics<parallel>], iteration_bounds = array<i64: 1>, scalar_prefetch = 0 : i64, scratch_operands = 0 : i64, tpu.core_type = #tpu.core_type<tc>, window_params = [{transform_indices = @transform_0, window_bounds = array<i64: 16, 128>}, {pipeline_mode = #tpu.pipeline_mode<synchronous>, transform_indices = @transform_1, window_bounds = array<i64: 128, 128>}, {pipeline_mode = #tpu.pipeline_mode<synchronous>, transform_indices = @transform_2, window_bounds = array<i64: 1, 128>}, {pipeline_mode = #tpu.pipeline_mode<synchronous>, transform_indices = @transform_3, window_bounds = array<i64: 128, 128>}, {pipeline_mode = #tpu.pipeline_mode<synchronous>, transform_indices = @transform_4, window_bounds = array<i64: 1, 128>}, {pipeline_mode = #tpu.pipeline_mode<synchronous>, transform_indices = @transform_5, window_bounds = array<i64: 128, 128>}, {pipeline_mode = #tpu.pipeline_mode<synchronous>, transform_indices = @transform_6, window_bounds = array<i64: 1, 128>}, {transform_indices = @transform_7, window_bounds = array<i64: 16, 128>}]} {
    %c0 = arith.constant 0 : index
    %c0_0 = arith.constant 0 : index
    %0 = vector.load %arg1[%c0, %c0_0] : memref<16x128xf32, #tpu.memory_space<vmem>>, vector<16x128xf32>
    %c0_1 = arith.constant 0 : index
    %c0_2 = arith.constant 0 : index
    %1 = vector.load %arg2[%c0_1, %c0_2] : memref<128x128xf32, #tpu.memory_space<vmem>>, vector<128x128xf32>
    %cst = arith.constant dense<0.000000e+00> : vector<16x128xf32>
    %2 = tpu.matmul %0, %1, %cst {dimension_numbers = #tpu.dot_dimension_numbers<[1], [0], [0], [1], [0, 0, 1, 1], [], []>} : vector<16x128xf32>, vector<128x128xf32>, vector<16x128xf32> -> vector<16x128xf32>
    %c0_3 = arith.constant 0 : index
    %c0_4 = arith.constant 0 : index
    %3 = vector.load %arg3[%c0_3, %c0_4] : memref<1x128xf32, #tpu.memory_space<vmem>>, vector<1x128xf32>
    %4 = vector.broadcast %3 : vector<1x128xf32> to vector<16x128xf32>
    %5 = arith.addf %2, %4 : vector<16x128xf32>
    %cst_5 = arith.constant 5.000000e-01 : f32
    %6 = vector.broadcast %cst_5 : f32 to vector<16x128xf32>
    %7 = arith.mulf %6, %5 : vector<16x128xf32>
    %cst_6 = arith.constant 0.707106769 : f32
    %8 = vector.broadcast %cst_6 : f32 to vector<16x128xf32>
    %9 = arith.mulf %5, %8 : vector<16x128xf32>
    %10 = math.erf %9 : vector<16x128xf32>
    %cst_7 = arith.constant 1.000000e+00 : f32
    %11 = vector.broadcast %cst_7 : f32 to vector<16x128xf32>
    %12 = arith.addf %11, %10 : vector<16x128xf32>
    %13 = arith.mulf %7, %12 : vector<16x128xf32>
    %c0_8 = arith.constant 0 : index
    %c0_9 = arith.constant 0 : index
    %14 = vector.load %arg4[%c0_8, %c0_9] : memref<128x128xf32, #tpu.memory_space<vmem>>, vector<128x128xf32>
    %cst_10 = arith.constant dense<0.000000e+00> : vector<16x128xf32>
    %15 = tpu.matmul %13, %14, %cst_10 {dimension_numbers = #tpu.dot_dimension_numbers<[1], [0], [0], [1], [0, 0, 1, 1], [], []>} : vector<16x128xf32>, vector<128x128xf32>, vector<16x128xf32> -> vector<16x128xf32>
    %c0_11 = arith.constant 0 : index
    %c0_12 = arith.constant 0 : index
    %16 = vector.load %arg5[%c0_11, %c0_12] : memref<1x128xf32, #tpu.memory_space<vmem>>, vector<1x128xf32>
    %17 = vector.broadcast %16 : vector<1x128xf32> to vector<16x128xf32>
    %18 = arith.addf %15, %17 : vector<16x128xf32>
    %cst_13 = arith.constant 5.000000e-01 : f32
    %19 = vector.broadcast %cst_13 : f32 to vector<16x128xf32>
    %20 = arith.mulf %19, %18 : vector<16x128xf32>
    %cst_14 = arith.constant 0.707106769 : f32
    %21 = vector.broadcast %cst_14 : f32 to vector<16x128xf32>
    %22 = arith.mulf %18, %21 : vector<16x128xf32>
    %23 = math.erf %22 : vector<16x128xf32>
    %cst_15 = arith.constant 1.000000e+00 : f32
    %24 = vector.broadcast %cst_15 : f32 to vector<16x128xf32>
    %25 = arith.addf %24, %23 : vector<16x128xf32>
    %26 = arith.mulf %20, %25 : vector<16x128xf32>
    %c0_16 = arith.constant 0 : index
    %c0_17 = arith.constant 0 : index
    %27 = vector.load %arg6[%c0_16, %c0_17] : memref<128x128xf32, #tpu.memory_space<vmem>>, vector<128x128xf32>
    %cst_18 = arith.constant dense<0.000000e+00> : vector<16x128xf32>
    %28 = tpu.matmul %26, %27, %cst_18 {dimension_numbers = #tpu.dot_dimension_numbers<[1], [0], [0], [1], [0, 0, 1, 1], [], []>} : vector<16x128xf32>, vector<128x128xf32>, vector<16x128xf32> -> vector<16x128xf32>
    %c0_19 = arith.constant 0 : index
    %c0_20 = arith.constant 0 : index
    %29 = vector.load %arg7[%c0_19, %c0_20] : memref<1x128xf32, #tpu.memory_space<vmem>>, vector<1x128xf32>
    %30 = vector.broadcast %29 : vector<1x128xf32> to vector<16x128xf32>
    %31 = arith.addf %28, %30 : vector<16x128xf32>
    %c0_21 = arith.constant 0 : index
    %c0_22 = arith.constant 0 : index
    %32 = vector.load %arg8[%c0_21, %c0_22] : memref<16x128xf32, #tpu.memory_space<vmem>>, vector<16x128xf32>
    tpu.vector_store %arg8[%c0_21, %c0_22], %31 {strides = array<i32>} : memref<16x128xf32, #tpu.memory_space<vmem>>, vector<16x128xf32>,
    return
  }
  func.func @transform_0(%arg0: i32) -> (i32, i32) {
    %c0_i32 = arith.constant 0 : i32
    %c0_i32_0 = arith.constant 0 : i32
    return %arg0, %c0_i32 : i32, i32
  }
  func.func @transform_1(%arg0: i32) -> (i32, i32) {
    %c0_i32 = arith.constant 0 : i32
    %c0_i32_0 = arith.constant 0 : i32
    %c0_i32_1 = arith.constant 0 : i32
    return %c0_i32, %c0_i32_0 : i32, i32
  }
  func.func @transform_2(%arg0: i32) -> (i32, i32) {
    %c0_i32 = arith.constant 0 : i32
    %c0_i32_0 = arith.constant 0 : i32
    %c0_i32_1 = arith.constant 0 : i32
    return %c0_i32, %c0_i32_0 : i32, i32
  }
  func.func @transform_3(%arg0: i32) -> (i32, i32) {
    %c0_i32 = arith.constant 0 : i32
    %c0_i32_0 = arith.constant 0 : i32
    %c0_i32_1 = arith.constant 0 : i32
    return %c0_i32, %c0_i32_0 : i32, i32
  }
  func.func @transform_4(%arg0: i32) -> (i32, i32) {
    %c0_i32 = arith.constant 0 : i32
    %c0_i32_0 = arith.constant 0 : i32
    %c0_i32_1 = arith.constant 0 : i32
    return %c0_i32, %c0_i32_0 : i32, i32
  }
  func.func @transform_5(%arg0: i32) -> (i32, i32) {
    %c0_i32 = arith.constant 0 : i32
    %c0_i32_0 = arith.constant 0 : i32
    %c0_i32_1 = arith.constant 0 : i32
    return %c0_i32, %c0_i32_0 : i32, i32
  }
  func.func @transform_6(%arg0: i32) -> (i32, i32) {
    %c0_i32 = arith.constant 0 : i32
    %c0_i32_0 = arith.constant 0 : i32
    %c0_i32_1 = arith.constant 0 : i32
    return %c0_i32, %c0_i32_0 : i32, i32
  }
  func.func @transform_7(%arg0: i32) -> (i32, i32) {
    %c0_i32 = arith.constant 0 : i32
    %c0_i32_0 = arith.constant 0 : i32
    return %arg0, %c0_i32 : i32, i32
  }
}

</mosaic_0001>

<bundles_post_ra>
// kernel: tpu_custom_call.1
= control target key start
LH: loop header
LB: loop body
LE: loop exit
PB: predicated region body
PF: predicated region fallthrough
CT: control target
= control target key end

     0   :  { %7 = vsyncpa [#allocation3], 0  ;;  %s719_s0 = inlined_call_operand.hbm [shape: f32[8,128], index: 0, kind: input, shape index: {}]   ;;  %s720_s1 = inlined_call_operand.hbm [shape: f32[16,128], index: 1, kind: input, shape index: {}]   ;;  %s721_s2 = inlined_call_operand.hbm [shape: f32[16,128], index: 2, kind: output, shape index: {}]  }
   0x1   :  { %8 = vsyncpa [#allocation6], 0 }
   0x2   :  { %10 = vsyncpa [#allocation6 + $0x1], 0 }
   0x3   :  { %11 = vsyncpa [#allocation4], 0 }
   0x4   :  { %13 = vsyncpa [#allocation4 + $0x1], 0  ;;  %s554_s9 = smov 0   ;;  %s556_s10 = smov 0  }
   0x5   :  { %s558_s11 = smov 0   ;;  %s560_s12 = smov 0  }
   0x6   :  { %s562_s13 = smov 0   ;;  %s564_s14 = smov 0  }
   0x7   :  { %s566_s15 = smov 0  }
   0x8 LB: > { %s292_s16 = sadd.s32 4294967295, %s534_s15   ;;  %s293_s17 = sadd.s32 4294967294, %s534_s15   ;;  %s534_s15 = sphi %s566_s15, %s19_s15   ;;  %s530_s14 = sphi %s564_s14, %s737_s14   ;;  %s526_s13 = sphi %s562_s13, %s736_s13   ;;  %s522_s12 = sphi %s560_s12, %s735_s12   ;;  %s518_s11 = sphi %s558_s11, %s734_s11   ;;  %s514_s10 = sphi %s556_s10, %s733_s10   ;;  %s510_s9 = sphi %s554_s9, %s732_s9  }
   0x9   : > { %p72_p0 = scmp.ne.s32.totalorder %s514_s10, %s510_s9  ;;  %p593_p1 = scmp.eq.s32.totalorder %s292_s16, 0 }
   0xa   : > { %p597_p2 = scmp.eq.s32.totalorder %s292_s16, 3  ;;  %p102_p3 = scmp.eq.s32.totalorder %s293_s17, 3 }
   0xb   : > { %p603_p4 = por %p593_p1, %p72_p0  ;;  %p294_p5 = scmp.ge.s32.totalorder %s534_s15, 1 }
   0xc   : > { %p608_p6 = por %p102_p3, %p72_p0  ;;  %p109_p7 = scmp.lt.s32.totalorder %s534_s15, 5 }
   0xd   : > { %s536_s23 = smov [#allocation2]   ;;  %s28_s25 = sadd.s32 1, %s526_s13 }
   0xe   : > { %s726_s21 = scalar_select %p608_p6, 1, 0 }
   0xf   : > { %p613_p8 = pnand %p294_p5, %p109_p7  ;;  %s122_s24 = sshll.u32 %s536_s23, 4  ;;  %s123_s24 = int_to_ptr.vmem [resolvable:$true] %s122_s24 }
  0x10   : > { %s399_s26 = scalar_lea.vmem %s123_s24, 128  ;;  %p407_p3 = scmp.lt.s32.totalorder %s123_s24, %s123_s24 }
  0x11   : > { %p315_p9 = pneg %p613_p8  ;;  %p400_p12 = scmp.ne.s32.totalorder %s123_s24, %s399_s26 }
  0x12   : > { %p408_p6 = scmp.lt.s32.totalorder %s399_s26, %s399_s26 }
  0x13   : > { %p316_p10 = pnand %p315_p9, %p593_p1 }
  0x14   : > { %p409_p5 = por %p408_p6, %p407_p3 }
  0x15   : > { %p390_p11 = pneg %p316_p10 }
  0x17   : > { %p402_p13 = pnand %p400_p12, %p390_p11 }
  0x19   : > { %p403_p0 = pneg %p402_p13 }
  0x1b   : > { %p410_p7 = pnand %p409_p5, %p403_p0 }
  0x1d   : > { %413 = shalt.err (!%p410_p7)
}
  0x1e   : > { %318 = dma.hbm_to_vmem [thread:$0]  (!%p316_p10), %s719_s0, 128, %s123_s24, [#allocation3]  }
  0x1f   : > { %p29_p9 = scmp.ge.s32.totalorder %s28_s25, 2  ;;  %s31_s29 = sadd.s32 1, %s530_s14 }
  0x20   : > { %s59_s30 = sadd.s32 1, %s518_s11  ;;  %p66_p6 = scmp.ne.s32.totalorder %s518_s11, %s514_s10 }
  0x21   : > { %s739_s25 = smov (%p29_p9, %s28_s25), 0  ;;  %s741_s29 = smov (!%p29_p9, %s31_s29), %s530_s14 }
  0x22   : > { %p67_p11 = scmp.eq.s32.totalorder %s534_s15, 0  ;;  %p635_p12 = por %p597_p2, %p66_p6 }
  0x23   : > { %p33_p13 = scmp.ge.s32.totalorder %s741_s29, 2  ;;  %p328_p0 = scmp.lt.s32.totalorder %s534_s15, 4 }
  0x24   : > { %s728_s3 = scalar_select %p635_p12, 1, 0 }
  0x25   : > { %p68_p3 = por %p67_p11, %p66_p6  ;;  %s133_s4 = sand.u32 1, %s518_s11  }
  0x26   : > { %s743_s29 = smov (%p33_p13, %s741_s29), 0  ;;  %s297_s5 = sshll.u32 %s133_s4, 3 }
  0x27   : > { %s56_s6 = ssub.s32 %s530_s14, %s743_s29  ;;  %s298_s7 = sshll.u32 %s530_s14, 7 }
  0x28   : > { %p57_p10 = scmp.eq.s32.totalorder %s56_s6, 0  ;;  %s142_s16 = scalar_lea.hbm %s720_s1, %s298_s7 }
  0x29   : > { %s137_s17 = scalar_lea.vmem [#allocation5], %s297_s5  ;;  %p654_p2 = pnand %p328_p0, %p68_p3 }
  0x2a   : > { %s144_s19 = sshll.u32 %s137_s17, 4  ;;  %s134_s26 = scalar_lea.sflag [#allocation6], %s133_s4  ;;  %s145_s19 = int_to_ptr.vmem [resolvable:$true] %s144_s19 }
  0x2b   : > { %s650_s23 = scalar_select %p57_p10, %s518_s11, %s59_s30  }
  0x2c   : > { %p416_p5 = pneg %p654_p2  ;;  %s427_s27 = scalar_lea.vmem %s145_s19, 128 }
  0x2d   : > { %p428_p7 = scmp.ne.s32.totalorder %s145_s19, %s427_s27  ;;  %s537_s28 = smov [#allocation5]  }
  0x2e   : > { %s432_s6 = sshll.u32 %s537_s28, 4  ;;  %s433_s6 = int_to_ptr.vmem [resolvable:$false] %s432_s6 }
  0x2f   : > { %p430_p9 = pnand %p428_p7, %p416_p5  ;;  %s434_s5 = scalar_lea.vmem %s433_s6, 256 }
  0x30   : > { %p435_p11 = scmp.lt.s32.totalorder %s145_s19, %s433_s6  ;;  %p436_p13 = scmp.lt.s32.totalorder %s434_s5, %s427_s27 }
  0x31   : > { %p431_p6 = pneg %p430_p9 }
  0x32   : > { %p437_p10 = por %p436_p13, %p435_p11 }
  0x34   : > { %p438_p12 = pnand %p437_p10, %p431_p6 }
  0x36   : > { %441 = shalt.err (!%p438_p12)
}
  0x37   : > { %322 = dma.hbm_to_vmem [thread:$0]  (!%p654_p2), %s142_s16, 128, %s145_s19, %s134_s26  }
  0x38   : > { %153 = sbr.rel (%p613_p8) target bundleno = 91 (0x5b), region = 28 }
  0x3d   : > { %497 = dma.done.wait (%p593_p1), [#allocation3], 128  }
  0x3e   : > { %499 = vsyncadd (%p593_p1), [#allocation3], 4294967168  ;;  %s669_s30 = sand.u32 1, %s514_s10  }
  0x3f   : > { %s301_s4 = sshll.u32 %s669_s30, 3  ;;  %s160_s7 = scalar_lea.sflag [#allocation6], %s669_s30 }
  0x40   : > { %s163_s8 = scalar_lea.vmem [#allocation5], %s301_s4 }
  0x41   : > { %501 = dma.done.wait (%p603_p4), %s160_s7, 128  }
  0x42   : > { %503 = vsyncadd (%p603_p4), %s160_s7, 4294967168  ;;  %s183_s22 = scalar_lea.vmem [#allocation7], %s301_s4  ;;  %s304_s13 = sshll.u32 %s522_s12, 7  ;;  %v184_v0 = vld [vmem:[%s163_s8] sm:$0xff]  ;;  %v185_v1 = vld [vmem:[#allocation2] sm:$0xff] }
  0x43   : > { %s202_s18 = sshll.u32 %s183_s22, 4  ;;  %v186_v2 = vadd.f32 %v185_v1, %v184_v0  ;;  %s200_s19 = scalar_lea.hbm %s721_s2, %s304_s13  ;;  %s203_s18 = int_to_ptr.vmem [resolvable:$true] %s202_s18 }
  0x44   : > { %s189_s24 = scalar_lea.sflag [#allocation4], %s669_s30  ;;  %s442_s26 = scalar_lea.vmem %s203_s18, 128 }
  0x45   : > { %187 = vst [vmem:[%s183_s22] sm:$0xff] %v186_v2  ;;  %p443_p1 = scmp.ne.s32.totalorder %s203_s18, %s442_s26  ;;  %p730_p8 = scmp.ne.s32.totalorder %s728_s3, 0 }
  0x46   : > { %s538_s20 = smov [#allocation7]  }
  0x47   : > { %p444_p4 = pnand %p443_p1, %p730_p8  ;;  %s446_s27 = sshll.u32 %s538_s20, 4  ;;  %s447_s27 = int_to_ptr.vmem [resolvable:$false] %s446_s27 }
  0x48   : > { %s448_s28 = scalar_lea.vmem %s447_s27, 256  ;;  %p449_p0 = scmp.lt.s32.totalorder %s203_s18, %s447_s27 }
  0x49   : > { %p445_p12 = pneg %p444_p4  ;;  %p450_p3 = scmp.lt.s32.totalorder %s448_s28, %s442_s26 }
  0x4b   : > { %p451_p2 = por %p450_p3, %p449_p0 }
  0x4d   : > { %p452_p5 = pnand %p451_p2, %p445_p12 }
  0x4f   : > { %455 = shalt.err (!%p452_p5)
}
  0x50   : > { %s456_s12 = scalar_lea.hbm %s200_s19, 128  ;;  %s460_s30 = scalar_lea.hbm %s721_s2, 256 }
  0x51   : > { %p457_p7 = scmp.ne.s32.totalorder %s200_s19, %s456_s12  ;;  %p461_p11 = scmp.lt.s32.totalorder %s200_s19, %s721_s2 }
  0x52   : > { %p462_p13 = scmp.lt.s32.totalorder %s460_s30, %s456_s12 }
  0x53   : > { %p458_p9 = pnand %p457_p7, %p730_p8 }
  0x54   : > { %p463_p10 = por %p462_p13, %p461_p11 }
  0x55   : > { %p459_p6 = pneg %p458_p9 }
  0x57   : > { %p464_p1 = pnand %p463_p10, %p459_p6 }
  0x59   : > { %467 = shalt.err (!%p464_p1)
}
  0x5a   : > { %313 = dma.vmem_to_hbm [thread:$0]  (%p730_p8), %s203_s18, 128, %s200_s19, %s189_s24  }
  0x5b PF: > { %p330_p4 = scmp.ge.s32.totalorder %s534_s15, 2  ;;  %s214_s8 = sand.u32 1, %s510_s9  }
  0x5c   : > { %p731_p12 = scmp.ne.s32.totalorder %s726_s21, 0  ;;  %s215_s22 = scalar_lea.sflag [#allocation4], %s214_s8 }
  0x5e   : > { %p324_p0 = pnand %p330_p4, %p731_p12 }
  0x60   : > { %p325_p3 = pneg %p324_p0 }
  0x62   : > { %505 = dma.done.wait (%p325_p3), %s215_s22, 128  }
  0x63   : > { %507 = vsyncadd (%p325_p3), %s215_s22, 4294967168  ;;  %s19_s15 = sadd.s32 1, %s534_s15   ;;  %s732_s9 = smov %s514_s10 }
  0x64   : > { %p16_p2 = scmp.ge.s32.totalorder %s19_s15, 6   ;;  %s733_s10 = smov %s518_s11 }
  0x65   : > { %s734_s11 = smov %s650_s23  ;;  %s735_s12 = smov %s530_s14 }
  0x66   : > { %s736_s13 = smov %s739_s25  ;;  %s737_s14 = smov %s743_s29 }
  0x67   :  { %18 = sbr.rel (!%p16_p2) target bundleno = 8 (0x8), region = 78 }
  0x6c   :  { %220 = vsyncpa [#allocation3], 1 }
  0x6d   :  { %222 = vsyncpa [#allocation3 + $0x1], 1 }
  0x6e   :  { %223 = vsyncpa [#allocation6], 1 }
  0x6f   :  { %225 = vsyncpa [#allocation6 + $0x1], 1 }
  0x70   :  { %226 = vsyncpa [#allocation4], 1 }
  0x71   :  { %228 = vsyncpa [#allocation4 + $0x1], 1 }

// kernel: tpu_custom_call.1
= control target key start
LH: loop header
LB: loop body
LE: loop exit
PB: predicated region body
PF: predicated region fallthrough
CT: control target
= control target key end

     0   :  { %12 = vsyncpa [#allocation3], 0  ;;  %s790_s0 = inlined_call_operand.hbm [shape: f32[16,128], index: 0, kind: input, shape index: {}]   ;;  %s791_s1 = inlined_call_operand.hbm [shape: f32[128,128], index: 1, kind: input, shape index: {}]   ;;  %s792_s2 = inlined_call_operand.vmem [shape: f32[1,128], index: 2, kind: input, shape index: {}]   ;;  %s793_s3 = inlined_call_operand.hbm [shape: f32[128,128], index: 3, kind: input, shape index: {}]   ;;  %s794_s4 = inlined_call_operand.vmem [shape: f32[1,128], index: 4, kind: input, shape index: {}]   ;;  %s795_s5 = inlined_call_operand.hbm [shape: f32[128,128], index: 5, kind: input, shape index: {}]   ;;  %s796_s6 = inlined_call_operand.vmem [shape: f32[1,128], index: 6, kind: input, shape index: {}]   ;;  %s797_s7 = inlined_call_operand.hbm [shape: f32[16,128], index: 7, kind: output, shape index: {}]  }
   0x1   :  { %13 = vsyncpa [#allocation6], 0 }
   0x2   :  { %14 = vsyncpa [#allocation9], 0 }
   0x3   :  { %15 = vsyncpa [#allocation4], 0  ;;  %s704_s24 = smov [#allocation5]   ;;  %s705_s26 = smov [#allocation2]  }
   0x4   :  { %s33_s25 = sshll.u32 %s704_s24, 4  ;;  %s21_s27 = sshll.u32 %s705_s26, 4  ;;  %s34_s25 = int_to_ptr.vmem [resolvable:$true] %s33_s25  ;;  %s22_s27 = int_to_ptr.vmem [resolvable:$true] %s21_s27 }
   0x5   :  { %s604_s28 = scalar_lea.vmem %s34_s25, 2048  ;;  %p609_p1 = scmp.lt.s32.totalorder %s34_s25, %s34_s25 }
   0x6   :  { %p605_p0 = scmp.ne.s32.totalorder %s34_s25, %s604_s28  ;;  %p610_p2 = scmp.lt.s32.totalorder %s604_s28, %s604_s28 }
   0x8   :  { %p611_p3 = por %p610_p2, %p609_p1 }
   0xa   :  { %p612_p4 = pnand %p611_p3, %p605_p0 }
   0xc   :  { %615 = shalt.err (!%p612_p4)
}
   0xd   :  { %s706_s29 = smov 128   ;;  %s707_s30 = smov 8  }
   0xe   :  { %39 = dma.hbm_to_vmem [thread:$0]  %s791_s1, 2048, %s34_s25, [#allocation6], %s706_s29, %s706_s29, %s707_s30  }
   0xf   :  { %s624_s10 = scalar_lea.vmem %s22_s27, 256  ;;  %p629_p6 = scmp.lt.s32.totalorder %s22_s27, %s22_s27 }
  0x10   :  { %p625_p5 = scmp.ne.s32.totalorder %s22_s27, %s624_s10  ;;  %p630_p7 = scmp.lt.s32.totalorder %s624_s10, %s624_s10 }
  0x12   :  { %p631_p8 = por %p630_p7, %p629_p6 }
  0x14   :  { %p632_p9 = pnand %p631_p8, %p625_p5 }
  0x16   :  { %635 = shalt.err (!%p632_p9)
}
  0x17   :  { %27 = dma.hbm_to_vmem [thread:$0]  %s790_s0, 256, %s22_s27, [#allocation3], %s706_s29, %s706_s29, %s707_s30  }
  0x18   :  { %s708_s13 = smov [#allocation7]   ;;  %s709_s15 = smov [#allocation8]  }
  0x19   :  { %s47_s14 = sshll.u32 %s708_s13, 4  ;;  %s61_s16 = sshll.u32 %s709_s15, 4  ;;  %s48_s14 = int_to_ptr.vmem [resolvable:$true] %s47_s14  ;;  %s62_s16 = int_to_ptr.vmem [resolvable:$true] %s61_s16 }
  0x1a   :  { %s644_s1 = scalar_lea.vmem %s48_s14, 2048  ;;  %p649_p11 = scmp.lt.s32.totalorder %s48_s14, %s48_s14 }
  0x1b   :  { %p645_p10 = scmp.ne.s32.totalorder %s48_s14, %s644_s1  ;;  %p650_p12 = scmp.lt.s32.totalorder %s644_s1, %s644_s1 }
  0x1d   :  { %p651_p13 = por %p650_p12, %p649_p11 }
  0x1f   :  { %p652_p0 = pnand %p651_p13, %p645_p10 }
  0x21   :  { %655 = shalt.err (!%p652_p0)
}
  0x22   :  { %53 = dma.hbm_to_vmem [thread:$0]  %s793_s3, 2048, %s48_s14, [#allocation6], %s706_s29, %s706_s29, %s707_s30  }
  0x23   :  { %s664_s0 = scalar_lea.vmem %s62_s16, 2048  ;;  %p669_p2 = scmp.lt.s32.totalorder %s62_s16, %s62_s16 }
  0x24   :  { %p665_p1 = scmp.ne.s32.totalorder %s62_s16, %s664_s0  ;;  %p670_p3 = scmp.lt.s32.totalorder %s664_s0, %s664_s0 }
  0x26   :  { %p671_p4 = por %p670_p3, %p669_p2 }
  0x28   :  { %p672_p5 = pnand %p671_p4, %p665_p1 }
  0x2a   :  { %675 = shalt.err (!%p672_p5)
}
  0x2b   :  { %67 = dma.hbm_to_vmem [thread:$0]  %s795_s5, 2048, %s62_s16, [#allocation9], %s706_s29, %s706_s29, %s707_s30  }
  0x2c   :  { %696 = dma.done.wait [#allocation3], 256  }
  0x2d   :  { %697 = vsyncadd [#allocation3], 4294967040 }
  0x2e   :  { %698 = dma.done.wait [#allocation6], 4096  }
  0x2f   :  { %699 = vsyncadd [#allocation6], 4294963200 }
  0x30   :  { %700 = dma.done.wait [#allocation9], 2048  }
  0x31   :  { %701 = vsyncadd [#allocation9], 4294965248  ;;  %v99_v0 = vld [vmem:[#allocation5 + $0x78] sm:$0xff]  ;;  %v98_v1 = vld [vmem:[#allocation5 + $0x70] sm:$0xff]  ;;  %s710_s23 = smov [#allocation10]  }
  0x32   :  { %476 = vmatprep.subr.mxu0 %v99_v0  ;;  %v97_v2 = vld [vmem:[#allocation5 + $0x68] sm:$0xff]  ;;  %v96_v3 = vld [vmem:[#allocation5 + $0x60] sm:$0xff]  ;;  %v82_v4 = vld [vmem:[#allocation2] sm:$0xff]  ;;  %s405_s24 = sshll.u32 %s710_s23, 4  ;;  %s406_s24 = int_to_ptr.vmem [resolvable:$true] %s405_s24 }
  0x33   :  { %477 = vmatpush3.msra.mxu0 %v99_v0  ;;  %v95_v5 = vld [vmem:[#allocation5 + $0x58] sm:$0xff]  ;;  %508 = vmatprep.mubr.f32.mxu0 %v82_v4  ;;  %v206_v7 = vld [vmem:[#allocation7 + $0x70] sm:$0xff]  ;;  %v205_v9 = vld [vmem:[#allocation7 + $0x68] sm:$0xff]  ;;  %s676_s25 = scalar_lea.vmem %s406_s24, 256  ;;  %p681_p7 = scmp.lt.s32.totalorder %s406_s24, %s406_s24 }
  0x34   :  { %478 = vmatprep.subr.mxu0 %v98_v1  ;;  %v207_v6 = vld [vmem:[#allocation7 + $0x78] sm:$0xff]  ;;  %v94_v8 = vld [vmem:[#allocation5 + $0x50] sm:$0xff]  ;;  %v93_v10 = vld [vmem:[#allocation5 + $0x48] sm:$0xff]  ;;  %p677_p6 = scmp.ne.s32.totalorder %s406_s24, %s676_s25  ;;  %p682_p8 = scmp.lt.s32.totalorder %s676_s25, %s676_s25 }
  0x35   :  { %479 = vmatpush3.msra.mxu0 %v98_v1  ;;  %511 = vmatprep.subr.mxu1 %v207_v6  ;;  %v92_v11 = vld [vmem:[#allocation5 + $0x40] sm:$0xff]  ;;  %v91_v12 = vld [vmem:[#allocation5 + $0x38] sm:$0xff]  ;;  %v90_v13 = vld [vmem:[#allocation5 + $0x30] sm:$0xff] }
  0x36   :  { %480 = vmatprep.subr.mxu0 %v97_v2  ;;  %512 = vmatpush3.msra.mxu1 %v207_v6  ;;  %v89_v14 = vld [vmem:[#allocation5 + $0x28] sm:$0xff]  ;;  %v88_v15 = vld [vmem:[#allocation5 + $0x20] sm:$0xff]  ;;  %v87_v16 = vld [vmem:[#allocation5 + $0x18] sm:$0xff]  ;;  %p683_p9 = por %p682_p8, %p681_p7 }
  0x37   :  { %481 = vmatpush3.msra.mxu0 %v97_v2  ;;  %513 = vmatprep.subr.mxu1 %v206_v7  ;;  %v86_v17 = vld [vmem:[#allocation5 + $0x10] sm:$0xff]  ;;  %v85_v18 = vld [vmem:[#allocation5 + $0x8] sm:$0xff]  ;;  %v84_v19 = vld [vmem:[#allocation5] sm:$0xff] }
  0x38   :  { %482 = vmatprep.subr.mxu0 %v96_v3  ;;  %514 = vmatpush3.msra.mxu1 %v206_v7  ;;  %v83_v20 = vld [vmem:[#allocation2 + $0x8] sm:$0xff]  ;;  %v204_v21 = vld [vmem:[#allocation7 + $0x60] sm:$0xff]  ;;  %v202_v23 = vld [vmem:[#allocation7 + $0x50] sm:$0xff]  ;;  %p684_p10 = pnand %p683_p9, %p677_p6 }
  0x39   :  { %483 = vmatpush3.msra.mxu0 %v96_v3  ;;  %515 = vmatprep.subr.mxu1 %v205_v9  ;;  %v203_v22 = vld [vmem:[#allocation7 + $0x58] sm:$0xff]  ;;  %v201_v24 = vld [vmem:[#allocation7 + $0x48] sm:$0xff]  ;;  %v200_v25 = vld [vmem:[#allocation7 + $0x40] sm:$0xff] }
  0x3a   :  { %484 = vmatprep.subr.mxu0 %v95_v5  ;;  %516 = vmatpush3.msra.mxu1 %v205_v9  ;;  %v199_v26 = vld [vmem:[#allocation7 + $0x38] sm:$0xff]  ;;  %v198_v27 = vld [vmem:[#allocation7 + $0x30] sm:$0xff]  ;;  %v197_v28 = vld [vmem:[#allocation7 + $0x28] sm:$0xff] }
  0x3b   :  { %485 = vmatpush3.msra.mxu0 %v95_v5  ;;  %517 = vmatprep.subr.mxu1 %v204_v21  ;;  %v196_v29 = vld [vmem:[#allocation7 + $0x20] sm:$0xff]  ;;  %v195_v30 = vld [vmem:[#allocation7 + $0x18] sm:$0xff]  ;;  %v194_v31 = vld [vmem:[#allocation7 + $0x10] sm:$0xff] }
  0x3c   :  { %486 = vmatprep.subr.mxu0 %v94_v8  ;;  %518 = vmatpush3.msra.mxu1 %v204_v21  ;;  %v193_v32 = vld [vmem:[#allocation7 + $0x8] sm:$0xff]  ;;  %v192_v33 = vld [vmem:[#allocation7] sm:$0xff]  ;;  %v315_v34 = vld [vmem:[#allocation8 + $0x78] sm:$0xff] }
  0x3d   :  { %487 = vmatpush3.msra.mxu0 %v94_v8  ;;  %519 = vmatprep.subr.mxu1 %v203_v22  ;;  %v314_v35 = vld [vmem:[#allocation8 + $0x70] sm:$0xff]  ;;  %v313_v36 = vld [vmem:[#allocation8 + $0x68] sm:$0xff]  ;;  %v312_v52 = vld [vmem:[#allocation8 + $0x60] sm:$0xff] }
  0x3e   :  { %488 = vmatprep.subr.mxu0 %v93_v10  ;;  %520 = vmatpush3.msra.mxu1 %v203_v22  ;;  %v419_v37 = vld [vmem:[%s792_s2] ss:$0 sm:$0xff]  ;;  %v311_v53 = vld [vmem:[#allocation8 + $0x58] sm:$0xff]  ;;  %v309_v55 = vld [vmem:[#allocation8 + $0x48] sm:$0xff] }
  0x3f   :  { %489 = vmatpush3.msra.mxu0 %v93_v10  ;;  %521 = vmatprep.subr.mxu1 %v202_v23  ;;  %v310_v54 = vld [vmem:[#allocation8 + $0x50] sm:$0xff]  ;;  %v308_v56 = vld [vmem:[#allocation8 + $0x40] sm:$0xff]  ;;  %v307_v57 = vld [vmem:[#allocation8 + $0x38] sm:$0xff] }
  0x40   :  { %490 = vmatprep.subr.mxu0 %v92_v11  ;;  %522 = vmatpush3.msra.mxu1 %v202_v23  ;;  %v306_v58 = vld [vmem:[#allocation8 + $0x30] sm:$0xff]  ;;  %v305_v59 = vld [vmem:[#allocation8 + $0x28] sm:$0xff]  ;;  %v304_v60 = vld [vmem:[#allocation8 + $0x20] sm:$0xff] }
  0x41   :  { %491 = vmatpush3.msra.mxu0 %v92_v11  ;;  %523 = vmatprep.subr.mxu1 %v201_v24  ;;  %v303_v61 = vld [vmem:[#allocation8 + $0x18] sm:$0xff]  ;;  %v302_v62 = vld [vmem:[#allocation8 + $0x10] sm:$0xff]  ;;  %v301_v63 = vld [vmem:[#allocation8 + $0x8] sm:$0xff] }
  0x42   :  { %492 = vmatprep.subr.mxu0 %v91_v12  ;;  %524 = vmatpush3.msra.mxu1 %v201_v24  ;;  %v300_v0 = vld [vmem:[#allocation8] sm:$0xff]  ;;  %v420_v1 = vld [vmem:[%s794_s4] ss:$0 sm:$0xff] }
  0x43   :  { %493 = vmatpush3.msra.mxu0 %v91_v12  ;;  %525 = vmatprep.subr.mxu1 %v200_v25 }
  0x44   :  { %494 = vmatprep.subr.mxu0 %v90_v13  ;;  %526 = vmatpush3.msra.mxu1 %v200_v25 }
  0x45   :  { %495 = vmatpush3.msra.mxu0 %v90_v13  ;;  %527 = vmatprep.subr.mxu1 %v199_v26 }
  0x46   :  { %496 = vmatprep.subr.mxu0 %v89_v14  ;;  %528 = vmatpush3.msra.mxu1 %v199_v26 }
  0x47   :  { %497 = vmatpush3.msra.mxu0 %v89_v14  ;;  %529 = vmatprep.subr.mxu1 %v198_v27 }
  0x48   :  { %498 = vmatprep.subr.mxu0 %v88_v15  ;;  %530 = vmatpush3.msra.mxu1 %v198_v27 }
  0x49   :  { %499 = vmatpush3.msra.mxu0 %v88_v15  ;;  %531 = vmatprep.subr.mxu1 %v197_v28 }
  0x4a   :  { %500 = vmatprep.subr.mxu0 %v87_v16  ;;  %532 = vmatpush3.msra.mxu1 %v197_v28 }
  0x4b   :  { %501 = vmatpush3.msra.mxu0 %v87_v16  ;;  %533 = vmatprep.subr.mxu1 %v196_v29  ;;  %v421_v16 = vld [vmem:[%s796_s6] ss:$0 sm:$0xff] }
  0x4c   :  { %502 = vmatprep.subr.mxu0 %v86_v17  ;;  %534 = vmatpush3.msra.mxu1 %v196_v29 }
  0x4d   :  { %503 = vmatpush3.msra.mxu0 %v86_v17  ;;  %535 = vmatprep.subr.mxu1 %v195_v30 }
  0x4e   :  { %504 = vmatprep.subr.mxu0 %v85_v18  ;;  %536 = vmatpush3.msra.mxu1 %v195_v30 }
  0x4f   :  { %505 = vmatpush3.msra.mxu0 %v85_v18  ;;  %537 = vmatprep.subr.mxu1 %v194_v31 }
  0x50   :  { %506 = vmatprep.subr.mxu0 %v84_v19  ;;  %538 = vmatpush3.msra.mxu1 %v194_v31 }
  0x51   :  { %507 = vmatpush3.msra.mxu0 %v84_v19  ;;  %539 = vmatprep.subr.mxu1 %v193_v32 }
  0x52   :  { %509 = vmatmul.mubr.f32.vlgmr.msra.gmra.mxu0 %v83_v20  ;;  %540 = vmatpush3.msra.mxu1 %v193_v32 }
  0x53   :  { %541 = vmatprep.subr.mxu1 %v192_v33  ;;  %546 = vmatprep.subr.mxu0 %v315_v34 }
  0x54   :  { %542 = vmatpush3.msra.mxu1 %v192_v33  ;;  %547 = vmatpush3.msra.mxu0 %v315_v34 }
  0x55   :  { %548 = vmatprep.subr.mxu0 %v314_v35 }
  0x56   :  { %549 = vmatpush3.msra.mxu0 %v314_v35 }
  0x57   :  { %550 = vmatprep.subr.mxu0 %v313_v36 }
  0x58   :  { %551 = vmatpush3.msra.mxu0 %v313_v36 }
  0x59   :  { %552 = vmatprep.subr.mxu0 %v312_v52 }
  0x5a   :  { %553 = vmatpush3.msra.mxu0 %v312_v52 }
  0x5b   :  { %554 = vmatprep.subr.mxu0 %v311_v53 }
  0x5c   :  { %555 = vmatpush3.msra.mxu0 %v311_v53 }
  0x5d   :  { %556 = vmatprep.subr.mxu0 %v310_v54 }
  0x5e   :  { %557 = vmatpush3.msra.mxu0 %v310_v54 }
  0x5f   :  { %558 = vmatprep.subr.mxu0 %v309_v55 }
  0x60   :  { %559 = vmatpush3.msra.mxu0 %v309_v55 }
  0x61   :  { %560 = vmatprep.subr.mxu0 %v308_v56 }
  0x62   :  { %561 = vmatpush3.msra.mxu0 %v308_v56 }
  0x63   :  { %562 = vmatprep.subr.mxu0 %v307_v57 }
  0x64   :  { %563 = vmatpush3.msra.mxu0 %v307_v57 }
  0x65   :  { %564 = vmatprep.subr.mxu0 %v306_v58 }
  0x66   :  { %565 = vmatpush3.msra.mxu0 %v306_v58 }
  0x67   :  { %566 = vmatprep.subr.mxu0 %v305_v59 }
  0x68   :  { %567 = vmatpush3.msra.mxu0 %v305_v59 }
  0x69   :  { %568 = vmatprep.subr.mxu0 %v304_v60 }
  0x6a   :  { %569 = vmatpush3.msra.mxu0 %v304_v60 }
  0x6b   :  { %570 = vmatprep.subr.mxu0 %v303_v61 }
  0x6c   :  { %571 = vmatpush3.msra.mxu0 %v303_v61 }
  0x6d   :  { %572 = vmatprep.subr.mxu0 %v302_v62 }
  0x6e   :  { %573 = vmatpush3.msra.mxu0 %v302_v62 }
  0x6f   :  { %574 = vmatprep.subr.mxu0 %v301_v63 }
  0x70   :  { %575 = vmatpush3.msra.mxu0 %v301_v63 }
  0x71   :  { %576 = vmatprep.subr.mxu0 %v300_v0 }
  0x72   :  { %577 = vmatpush3.msra.mxu0 %v300_v0 }
 0x112   :  { %v510_v38 = vpop.f32.mrf.mxu0 }
 0x113   :  { %v179_v39 = vadd.f32 %v510_v38, %v419_v37 }
 0x114   :  { %v173_v40 = vpop.f32.mrf.mxu0 }
 0x115   :  { %v185_v41 = vmul.f32 0.70710677, %v179_v39  ;;  %v174_v42 = vadd.f32 %v419_v37, %v173_v40  ;;  %v183_v49 = vmul.f32 0.5, %v179_v39 }
 0x117   :  { %588 = verf.f32 %v185_v41  ;;  %v184_v43 = vmul.f32 0.70710677, %v174_v42  ;;  %v182_v47 = vmul.f32 0.5, %v174_v42 }
 0x119   :  { %590 = verf.f32 %v184_v43 }
 0x124   :  { %v589_v44 = vpop.eup %588 }
 0x125   :  { %v189_v46 = vadd.f32 1.0, %v589_v44 }
 0x126   :  { %v591_v45 = vpop.eup %590 }
 0x127   :  { %v188_v48 = vadd.f32 1.0, %v591_v45  ;;  %v191_v51 = vmul.f32 %v189_v46, %v183_v49 }
 0x129   :  { %v190_v50 = vmul.f32 %v188_v48, %v182_v47 }
 0x12b   :  { %543 = vmatprep.mubr.f32.mxu1 %v190_v50 }
 0x12c   :  { %544 = vmatmul.mubr.f32.vlgmr.msra.gmra.mxu1 %v191_v51 }
 0x1ec   :  { %v545_v2 = vpop.f32.mrf.mxu1 }
 0x1ed   :  { %v287_v3 = vadd.f32 %v545_v2, %v420_v1 }
 0x1ee   :  { %v281_v4 = vpop.f32.mrf.mxu1 }
 0x1ef   :  { %v293_v5 = vmul.f32 0.70710677, %v287_v3  ;;  %v282_v6 = vadd.f32 %v420_v1, %v281_v4  ;;  %v291_v13 = vmul.f32 0.5, %v287_v3 }
 0x1f1   :  { %592 = verf.f32 %v293_v5  ;;  %v292_v7 = vmul.f32 0.70710677, %v282_v6  ;;  %v290_v11 = vmul.f32 0.5, %v282_v6 }
 0x1f3   :  { %594 = verf.f32 %v292_v7 }
 0x1fe   :  { %v593_v8 = vpop.eup %592 }
 0x1ff   :  { %v297_v10 = vadd.f32 1.0, %v593_v8 }
 0x200   :  { %v595_v9 = vpop.eup %594 }
 0x201   :  { %v296_v12 = vadd.f32 1.0, %v595_v9  ;;  %v299_v15 = vmul.f32 %v297_v10, %v291_v13 }
 0x203   :  { %v298_v14 = vmul.f32 %v296_v12, %v290_v11 }
 0x205   :  { %578 = vmatprep.mubr.f32.mxu0 %v298_v14 }
 0x206   :  { %579 = vmatmul.mubr.f32.vlgmr.msra.gmra.mxu0 %v299_v15 }
 0x2c6   :  { %v580_v17 = vpop.f32.mrf.mxu0 }
 0x2c7   :  { %v395_v18 = vadd.f32 %v580_v17, %v421_v16 }
 0x2c8   :  { %v389_v19 = vpop.f32.mrf.mxu0 }
 0x2c9   :  { %399 = vst [vmem:[#allocation10 + $0x8] sm:$0xff] %v395_v18  ;;  %v390_v20 = vadd.f32 %v421_v16, %v389_v19 }
 0x2cb   :  { %398 = vst [vmem:[#allocation10] sm:$0xff] %v390_v20 }
 0x2cc   :  { %687 = shalt.err (!%p684_p10)
}
 0x2cd   :  { %411 = dma.vmem_to_hbm [thread:$0]  %s406_s24, 256, %s797_s7, [#allocation4], %s706_s29, %s706_s29, %s707_s30  }
 0x2ce   :  { %702 = dma.done.wait [#allocation4], 256  }
 0x2cf   :  { %703 = vsyncadd [#allocation4], 4294967040 }
 0x2d0   :  { %415 = vsyncpa [#allocation3], 1 }
 0x2d1   :  { %416 = vsyncpa [#allocation6], 1 }
 0x2d2   :  { %417 = vsyncpa [#allocation9], 1 }
 0x2d3   :  { %418 = vsyncpa [#allocation4], 1 }

</bundles_post_ra>
